<compile_context>
chip_gen: v7x
topology: tpu7x:2x2x1
jax: 0.10.0
libtpu: 0.0.40
codegen_flags: <defaults>
</compile_context>

<pallas_src>
import jax
import jax.numpy as jnp
from jax.experimental import pallas as pl
from jax.experimental.pallas import tpu as pltpu

NUM_OPS = 5          # len(InnerCellArch) == 5
KSIZE = 3
STRIDE = 1
PADDING = 1
LANE = 128           # TPU lane width
MAX_TM = 1024        # rows per M tile (multiple of 8), sized well under VMEM


def _round_up(x, m):
    return (x + m - 1) // m * m


# ---------------------------------------------------------------------------
# Pallas kernel: one M-tile of the folded-weight matmul.
#   patches_ref: (TM, K)       bf16
#   w_ref:       (K, Cout_pad) bf16   (same block reused for every M tile)
#   out_ref:     (TM, Cout_pad) f32
# ---------------------------------------------------------------------------
def folded_conv_kernel(patches_ref, w_ref, out_ref):
    out_ref[...] = jnp.dot(
        patches_ref[...], w_ref[...], preferred_element_type=jnp.float32
    )


def folded_conv_pallas(patches, w_eff):
    """patches: (M, K) bf16; w_eff: (K, Cout_pad) bf16 -> (M, Cout_pad) f32."""
    M, K = patches.shape
    _, cout_p = w_eff.shape

    tm = min(MAX_TM, _round_up(M, 8))
    m_pad = _round_up(M, tm)
    if m_pad != M:
        patches = jnp.pad(patches, ((0, m_pad - M), (0, 0)))

    grid_spec = pltpu.PrefetchScalarGridSpec(
        num_scalar_prefetch=0,
        grid=(m_pad // tm,),
        in_specs=[
            pl.BlockSpec((tm, K), lambda i: (i, 0)),       # patches M-tile
            pl.BlockSpec((K, cout_p), lambda i: (0, 0)),   # folded weights (reused)
        ],
        out_specs=pl.BlockSpec((tm, cout_p), lambda i: (i, 0)),
    )

    out = pl.pallas_call(
        folded_conv_kernel,
        out_shape=jax.ShapeDtypeStruct((m_pad, cout_p), jnp.float32),
        grid_spec=grid_spec,
        compiler_params=pltpu.CompilerParams(
            dimension_semantics=("parallel",),
        ),
    )(patches, w_eff)
    return out[:M]


# ---------------------------------------------------------------------------
# Glue: im2col (NCHW -> [N*Ho*Wo, C*Kh*Kw]) and parameter folding.
# TODO(synk): patch construction could be fused on-chip (9 shifted VMEM views
# per M tile) to cut the 9x im2col HBM inflation further; kept in the wrapper
# (inside the same jit, in bf16) for clarity.
# ---------------------------------------------------------------------------
def im2col_nchw(x, k=KSIZE, pad=PADDING, stride=STRIDE):
    n, c, h, w = x.shape
    xp = jnp.pad(x, ((0, 0), (0, 0), (pad, pad), (pad, pad)))
    ho = (h + 2 * pad - k) // stride + 1
    wo = (w + 2 * pad - k) // stride + 1
    cols = []
    for kh in range(k):
        for kw in range(k):
            cols.append(
                xp[:, :, kh:kh + ho * stride:stride, kw:kw + wo * stride:stride]
            )
    # (KK, N, C, Ho, Wo) -> (N, Ho, Wo, C, KK) -> (N*Ho*Wo, C*KK)
    patches = jnp.stack(cols, axis=0).transpose(1, 3, 4, 2, 0)
    return patches.reshape(n * ho * wo, c * k * k), ho, wo


@jax.jit
def layer_forward(x_nchw, conv_weights, alphas):
    """Forward of Layer with numOfInnerCell=1 (single InnerCell, no concat)."""
    n, c, h, w = x_nchw.shape
    n_ops, cout, cin, kh, kw = conv_weights.shape
    assert cin == c and kh == KSIZE and kw == KSIZE

    # Fold softmax(alpha) into the (linear) conv weights -> single effective
    # weight matrix, feature order (C, kh, kw) matching im2col.
    alpha_sm = jax.nn.softmax(alphas.astype(jnp.float32))
    w_mat = conv_weights.astype(jnp.float32).reshape(
        n_ops, cout, cin * kh * kw
    ).transpose(0, 2, 1)                                       # (ops, K, Cout)
    w_eff = jnp.einsum("o,okc->kc", alpha_sm, w_mat)           # (K, Cout)

    # Lane-dense output: pad Cout up to a multiple of 128.
    cout_p = _round_up(cout, LANE)
    w_eff = jnp.pad(w_eff, ((0, 0), (0, cout_p - cout))).astype(jnp.bfloat16)

    # bf16 im2col patches (f32 accumulation happens on the MXU).
    patches, ho, wo = im2col_nchw(x_nchw.astype(jnp.bfloat16))  # (M, C*9)

    out_flat = folded_conv_pallas(patches, w_eff)               # (M, Cout_pad) f32
    out = out_flat[:, :cout].reshape(n, ho, wo, cout).transpose(0, 3, 1, 2)
    return out                                                  # NCHW, f32


if __name__ == "__main__":
    # Module-consistent small shapes:
    #   inputChannel=3, outputChannel=96, numOfInnerCell=1, stride=1, padding=1
    batch, in_c, hw = 2, 3, 16
    out_c = 96  # outputChannel // numOfInnerCell

    key = jax.random.PRNGKey(0)
    k_x, k_w, k_a = jax.random.split(key, 3)

    x = jax.random.normal(k_x, (batch, in_c, hw, hw), dtype=jnp.float32)
    conv_w = 0.1 * jax.random.normal(
        k_w, (NUM_OPS, out_c, in_c, KSIZE, KSIZE), dtype=jnp.float32
    )
    alphas = jax.random.normal(k_a, (NUM_OPS,), dtype=jnp.float32)

    out = layer_forward(x, conv_w, alphas)
    out = jax.block_until_ready(out)
    assert out.shape == (batch, out_c, hw, hw), out.shape

    # Reference with the same bf16-rounded inputs, f32 accumulation.
    patches_ref, ho, wo = im2col_nchw(x.astype(jnp.bfloat16))
    w_mat_ref = conv_w.reshape(NUM_OPS, out_c, -1).transpose(0, 2, 1)
    sm = jax.nn.softmax(alphas)
    w_eff_ref = jnp.einsum("o,okc->kc", sm, w_mat_ref).astype(jnp.bfloat16)
    ref = jnp.dot(
        patches_ref.astype(jnp.float32),
        w_eff_ref.astype(jnp.float32),
        precision=jax.lax.Precision.HIGHEST,
    ).reshape(batch, ho, wo, out_c).transpose(0, 3, 1, 2)
    assert jnp.allclose(out, ref, atol=2e-3, rtol=2e-3), (
        float(jnp.max(jnp.abs(out - ref)))
    )

    # Looser sanity check vs pure-f32 math (bf16 input rounding drift only).
    w_eff_f32 = jnp.einsum("o,okc->kc", sm, w_mat_ref)
    patches_f32, _, _ = im2col_nchw(x)
    ref_f32 = jnp.dot(
        patches_f32, w_eff_f32, precision=jax.lax.Precision.HIGHEST
    ).reshape(batch, ho, wo, out_c).transpose(0, 3, 1, 2)
    assert jnp.allclose(out, ref_f32, atol=5e-2, rtol=5e-2), (
        float(jnp.max(jnp.abs(out - ref_f32)))
    )

    print("KERNEL_OK")
</pallas_src>

<mosaic_0001>
module attributes {stable_mosaic.version = 11 : i64} {
  func.func @folded_conv_kernel(%arg0: i32, %arg1: memref<512x27xbf16, #tpu.memory_space<vmem>>, %arg2: memref<27x128xbf16, #tpu.memory_space<vmem>>, %arg3: memref<512x128xf32, #tpu.memory_space<vmem>>) attributes {dimension_semantics = [#tpu.dimension_semantics<parallel>], iteration_bounds = array<i64: 1>, scalar_prefetch = 0 : i64, scratch_operands = 0 : i64, tpu.core_type = #tpu.core_type<tc>, window_params = [{transform_indices = @transform_0, window_bounds = array<i64: 512, 27>}, {pipeline_mode = #tpu.pipeline_mode<synchronous>, transform_indices = @transform_1, window_bounds = array<i64: 27, 128>}, {transform_indices = @transform_2, window_bounds = array<i64: 512, 128>}]} {
    %c0 = arith.constant 0 : index
    %c0_0 = arith.constant 0 : index
    %0 = vector.load %arg1[%c0, %c0_0] : memref<512x27xbf16, #tpu.memory_space<vmem>>, vector<512x27xbf16>
    %c0_1 = arith.constant 0 : index
    %c0_2 = arith.constant 0 : index
    %1 = vector.load %arg2[%c0_1, %c0_2] : memref<27x128xbf16, #tpu.memory_space<vmem>>, vector<27x128xbf16>
    %cst = arith.constant dense<0.000000e+00> : vector<512x128xf32>
    %2 = tpu.matmul %0, %1, %cst {dimension_numbers = #tpu.dot_dimension_numbers<[1], [0], [0], [1], [0, 0, 1, 1], [], []>} : vector<512x27xbf16>, vector<27x128xbf16>, vector<512x128xf32> -> vector<512x128xf32>
    %c0_3 = arith.constant 0 : index
    %c0_4 = arith.constant 0 : index
    %3 = vector.load %arg3[%c0_3, %c0_4] : memref<512x128xf32, #tpu.memory_space<vmem>>, vector<512x128xf32>
    tpu.vector_store %arg3[%c0_3, %c0_4], %2 {strides = array<i32>} : memref<512x128xf32, #tpu.memory_space<vmem>>, vector<512x128xf32>,
    return
  }
  func.func @transform_0(%arg0: i32) -> (i32, i32) {
    %c0_i32 = arith.constant 0 : i32
    %c0_i32_0 = arith.constant 0 : i32
    return %arg0, %c0_i32 : i32, i32
  }
  func.func @transform_1(%arg0: i32) -> (i32, i32) {
    %c0_i32 = arith.constant 0 : i32
    %c0_i32_0 = arith.constant 0 : i32
    %c0_i32_1 = arith.constant 0 : i32
    return %c0_i32, %c0_i32_0 : i32, i32
  }
  func.func @transform_2(%arg0: i32) -> (i32, i32) {
    %c0_i32 = arith.constant 0 : i32
    %c0_i32_0 = arith.constant 0 : i32
    return %arg0, %c0_i32 : i32, i32
  }
}

</mosaic_0001>

<bundles_post_ra>
// kernel: layer_forward.1
= control target key start
LH: loop header
LB: loop body
LE: loop exit
PB: predicated region body
PF: predicated region fallthrough
CT: control target
= control target key end

     0   :  { %vm349_vm0 = vcmask 1044480   ;;  %vm350_vm1 = vcmask 1045504   ;;  %v959_v2 = vmov 65535   ;;  %vm252_vm2 = vcmask 220160   ;;  %s1124_s0 = inlined_call_operand.vmem [shape: bf16[512,27], index: 0, kind: input, shape index: {}]   ;;  %s1125_s1 = inlined_call_operand.vmem [shape: bf16[27,128], index: 1, kind: input, shape index: {}]   ;;  %s1126_s2 = inlined_call_operand.hbm [shape: f32[512,128], index: 2, kind: output, shape index: {}]  }
   0x1   :  { %v901_v0 = vld [vmem:[%s1125_s1] sm:$0xff]   ;;  %v902_v1 = vld [vmem:[%s1125_s1 + $0x8] sm:$0x3f]   ;;  %v351_v3 = vsel %vm349_vm0, 4294967295, %v959_v2  ;;  %v907_v10 = vld [vmem:[%s1124_s0 + $0x10] sm:$0xff]  }
   0x2   :  { %825 = vmatprep.subr.bf16.mxu0 %v901_v0  ;;  %893 = vmatprep.subr.bf16.mxu1 %v901_v0  ;;  %v903_v4 = vld [vmem:[%s1124_s0] sm:$0xff]   ;;  %v352_v6 = vsel %vm350_vm1, %v351_v3, 0  ;;  %v905_v8 = vld [vmem:[%s1124_s0 + $0x8] sm:$0xff]   ;;  %v908_v11 = vld [vmem:[%s1124_s0 + $0x90] sm:$0xff]  }
   0x3   :  { %826 = vmatpush3.bf16.msra.mxu0 %v901_v0  ;;  %895 = vmatpush3.bf16.msra.mxu1 %v901_v0  ;;  %v904_v5 = vld [vmem:[%s1124_s0 + $0x80] sm:$0xff]   ;;  %v354_v7 = vand.u32 %v902_v1, %v352_v6  ;;  %v906_v9 = vld [vmem:[%s1124_s0 + $0x88] sm:$0xff]   ;;  %v909_v12 = vld [vmem:[%s1124_s0 + $0x18] sm:$0xff]  }
   0x4   :  { %829 = vmatprep.mubr.msk.bf16.mxu0 %vm252_vm2, %v903_v4  ;;  %861 = vmatprep.mubr.msk.bf16.mxu1 %vm252_vm2, %v904_v5  ;;  %v910_v13 = vld [vmem:[%s1124_s0 + $0x98] sm:$0xff]   ;;  %v911_v14 = vld [vmem:[%s1124_s0 + $0x20] sm:$0xff]   ;;  %v913_v16 = vld [vmem:[%s1124_s0 + $0x28] sm:$0xff]  }
   0x5   :  { %827 = vmatprep.subr.bf16.mxu0 %v354_v7  ;;  %894 = vmatprep.subr.bf16.mxu1 %v354_v7  ;;  %v912_v15 = vld [vmem:[%s1124_s0 + $0xa0] sm:$0xff]   ;;  %v914_v17 = vld [vmem:[%s1124_s0 + $0xa8] sm:$0xff]   ;;  %v915_v18 = vld [vmem:[%s1124_s0 + $0x30] sm:$0xff]  }
   0x6   :  { %v916_v19 = vld [vmem:[%s1124_s0 + $0xb0] sm:$0xff]   ;;  %v917_v20 = vld [vmem:[%s1124_s0 + $0x38] sm:$0xff]   ;;  %v919_v22 = vld [vmem:[%s1124_s0 + $0x40] sm:$0xff]  }
   0x7   :  { %828 = vmatpush3.bf16.msra.mxu0 %v354_v7  ;;  %896 = vmatpush3.bf16.msra.mxu1 %v354_v7  ;;  %v918_v21 = vld [vmem:[%s1124_s0 + $0xb8] sm:$0xff]   ;;  %v920_v23 = vld [vmem:[%s1124_s0 + $0xc0] sm:$0xff]  }
   0xa   :  { %830 = vmatmul.mubr.msk.bf16.vlgmr.msra.gmra.mrb[0].mxu0 %vm252_vm2, %v905_v8  ;;  %862 = vmatmul.mubr.msk.bf16.vlgmr.msra.gmra.mrb[0].mxu1 %vm252_vm2, %v906_v9 }
   0xb   :  { %833 = vmatprep.mubr.msk.bf16.mxu0 %vm252_vm2, %v907_v10  ;;  %865 = vmatprep.mubr.msk.bf16.mxu1 %vm252_vm2, %v908_v11 }
  0x12   :  { %834 = vmatmul.mubr.msk.bf16.gmra.mrb[4].mxu0 %vm252_vm2, %v909_v12  ;;  %866 = vmatmul.mubr.msk.bf16.gmra.mrb[4].mxu1 %vm252_vm2, %v910_v13 }
  0x13   :  { %837 = vmatprep.mubr.msk.bf16.mxu0 %vm252_vm2, %v911_v14  ;;  %869 = vmatprep.mubr.msk.bf16.mxu1 %vm252_vm2, %v912_v15 }
  0x1a   :  { %838 = vmatmul.mubr.msk.bf16.gmra.mrb[8].mxu0 %vm252_vm2, %v913_v16  ;;  %870 = vmatmul.mubr.msk.bf16.gmra.mrb[8].mxu1 %vm252_vm2, %v914_v17 }
  0x1b   :  { %841 = vmatprep.mubr.msk.bf16.mxu0 %vm252_vm2, %v915_v18  ;;  %873 = vmatprep.mubr.msk.bf16.mxu1 %vm252_vm2, %v916_v19 }
  0x1c   :  { %7 = vsyncpa [#allocation3], 0  ;;  %v921_v24 = vld [vmem:[%s1124_s0 + $0x48] sm:$0xff]   ;;  %v923_v26 = vld [vmem:[%s1124_s0 + $0x50] sm:$0xff]  }
  0x1d   :  { %v922_v25 = vld [vmem:[%s1124_s0 + $0xc8] sm:$0xff]   ;;  %v924_v27 = vld [vmem:[%s1124_s0 + $0xd0] sm:$0xff]   ;;  %v925_v28 = vld [vmem:[%s1124_s0 + $0x58] sm:$0xff]  }
  0x1e   :  { %v926_v29 = vld [vmem:[%s1124_s0 + $0xd8] sm:$0xff]   ;;  %v927_v30 = vld [vmem:[%s1124_s0 + $0x60] sm:$0xff]   ;;  %v929_v32 = vld [vmem:[%s1124_s0 + $0x68] sm:$0xff]  }
  0x1f   :  { %v928_v31 = vld [vmem:[%s1124_s0 + $0xe0] sm:$0xff]   ;;  %v930_v33 = vld [vmem:[%s1124_s0 + $0xe8] sm:$0xff]   ;;  %v931_v34 = vld [vmem:[%s1124_s0 + $0x70] sm:$0xff]  }
  0x20   :  { %v932_v35 = vld [vmem:[%s1124_s0 + $0xf0] sm:$0xff]   ;;  %v933_v36 = vld [vmem:[%s1124_s0 + $0x78] sm:$0xff]  }
  0x21   :  { %v934_v37 = vld [vmem:[%s1124_s0 + $0xf8] sm:$0xff]   ;;  %s960_s0 = smov [#allocation2]  }
  0x22   :  { %842 = vmatmul.mubr.msk.bf16.gmra.mrb[12].mxu0 %vm252_vm2, %v917_v20  ;;  %874 = vmatmul.mubr.msk.bf16.gmra.mrb[12].mxu1 %vm252_vm2, %v918_v21  ;;  %s714_s18 = sshll.u32 %s960_s0, 4  ;;  %s715_s18 = int_to_ptr.vmem [resolvable:$true] %s714_s18 }
  0x23   :  { %845 = vmatprep.mubr.msk.bf16.mxu0 %vm252_vm2, %v919_v22  ;;  %877 = vmatprep.mubr.msk.bf16.mxu1 %vm252_vm2, %v920_v23  ;;  %s935_s19 = scalar_lea.vmem %s715_s18, 8192  ;;  %p940_p1 = scmp.lt.s32.totalorder %s715_s18, %s715_s18 }
  0x24   :  { %p936_p0 = scmp.ne.s32.totalorder %s715_s18, %s935_s19  ;;  %p941_p2 = scmp.lt.s32.totalorder %s935_s19, %s935_s19 }
  0x26   :  { %p942_p3 = por %p941_p2, %p940_p1 }
  0x28   :  { %p943_p4 = pnand %p942_p3, %p936_p0 }
  0x2a   :  { %846 = vmatmul.mubr.msk.bf16.gmra.mrb[16].mxu0 %vm252_vm2, %v921_v24  ;;  %878 = vmatmul.mubr.msk.bf16.gmra.mrb[16].mxu1 %vm252_vm2, %v922_v25 }
  0x2b   :  { %849 = vmatprep.mubr.msk.bf16.mxu0 %vm252_vm2, %v923_v26  ;;  %881 = vmatprep.mubr.msk.bf16.mxu1 %vm252_vm2, %v924_v27 }
  0x32   :  { %850 = vmatmul.mubr.msk.bf16.gmra.mrb[20].mxu0 %vm252_vm2, %v925_v28  ;;  %882 = vmatmul.mubr.msk.bf16.gmra.mrb[20].mxu1 %vm252_vm2, %v926_v29 }
  0x33   :  { %853 = vmatprep.mubr.msk.bf16.mxu0 %vm252_vm2, %v927_v30  ;;  %885 = vmatprep.mubr.msk.bf16.mxu1 %vm252_vm2, %v928_v31 }
  0x3a   :  { %854 = vmatmul.mubr.msk.bf16.gmra.mrb[24].mxu0 %vm252_vm2, %v929_v32  ;;  %886 = vmatmul.mubr.msk.bf16.gmra.mrb[24].mxu1 %vm252_vm2, %v930_v33 }
  0x3b   :  { %857 = vmatprep.mubr.msk.bf16.mxu0 %vm252_vm2, %v931_v34  ;;  %889 = vmatprep.mubr.msk.bf16.mxu1 %vm252_vm2, %v932_v35 }
  0x42   :  { %858 = vmatmul.mubr.msk.bf16.gmra.mrb[28].mxu0 %vm252_vm2, %v933_v36  ;;  %890 = vmatmul.mubr.msk.bf16.gmra.mrb[28].mxu1 %vm252_vm2, %v934_v37 }
  0xdd   :  { %v831_v38 = vpop.f32.mrb[0].mxu0  ;;  %v863_v39 = vpop.f32.mrb[0].mxu1 }
  0xde   :  { %647 = vst [vmem:[#allocation2 + $0x10] sm:$0xff] %v831_v38  ;;  %679 = vst [vmem:[#allocation2 + $0x110] sm:$0xff] %v863_v39  ;;  %v390_v40 = vpop.f32.mrb[1].mxu0  ;;  %v518_v41 = vpop.f32.mrb[1].mxu1 }
  0xdf   :  { %645 = vst [vmem:[#allocation2] sm:$0xff] %v390_v40  ;;  %677 = vst [vmem:[#allocation2 + $0x100] sm:$0xff] %v518_v41  ;;  %v832_v42 = vpop.f32.mrb[2].mxu0  ;;  %v864_v43 = vpop.f32.mrb[2].mxu1 }
  0xe0   :  { %648 = vst [vmem:[#allocation2 + $0x18] sm:$0xff] %v832_v42  ;;  %680 = vst [vmem:[#allocation2 + $0x118] sm:$0xff] %v864_v43  ;;  %v393_v44 = vpop.f32.mrb[3].mxu0  ;;  %v521_v45 = vpop.f32.mrb[3].mxu1 }
  0xe1   :  { %646 = vst [vmem:[#allocation2 + $0x8] sm:$0xff] %v393_v44  ;;  %678 = vst [vmem:[#allocation2 + $0x108] sm:$0xff] %v521_v45 }
  0xe5   :  { %v835_v46 = vpop.f32.mrb[4].mxu0  ;;  %v867_v47 = vpop.f32.mrb[4].mxu1 }
  0xe6   :  { %651 = vst [vmem:[#allocation2 + $0x30] sm:$0xff] %v835_v46  ;;  %683 = vst [vmem:[#allocation2 + $0x130] sm:$0xff] %v867_v47  ;;  %v406_v48 = vpop.f32.mrb[5].mxu0  ;;  %v534_v49 = vpop.f32.mrb[5].mxu1 }
  0xe7   :  { %649 = vst [vmem:[#allocation2 + $0x20] sm:$0xff] %v406_v48  ;;  %681 = vst [vmem:[#allocation2 + $0x120] sm:$0xff] %v534_v49  ;;  %v836_v50 = vpop.f32.mrb[6].mxu0  ;;  %v868_v51 = vpop.f32.mrb[6].mxu1 }
  0xe8   :  { %652 = vst [vmem:[#allocation2 + $0x38] sm:$0xff] %v836_v50  ;;  %684 = vst [vmem:[#allocation2 + $0x138] sm:$0xff] %v868_v51  ;;  %v409_v52 = vpop.f32.mrb[7].mxu0  ;;  %v537_v53 = vpop.f32.mrb[7].mxu1 }
  0xe9   :  { %650 = vst [vmem:[#allocation2 + $0x28] sm:$0xff] %v409_v52  ;;  %682 = vst [vmem:[#allocation2 + $0x128] sm:$0xff] %v537_v53 }
  0xed   :  { %v839_v54 = vpop.f32.mrb[8].mxu0  ;;  %v871_v55 = vpop.f32.mrb[8].mxu1 }
  0xee   :  { %655 = vst [vmem:[#allocation2 + $0x50] sm:$0xff] %v839_v54  ;;  %687 = vst [vmem:[#allocation2 + $0x150] sm:$0xff] %v871_v55  ;;  %v422_v56 = vpop.f32.mrb[9].mxu0  ;;  %v550_v57 = vpop.f32.mrb[9].mxu1 }
  0xef   :  { %653 = vst [vmem:[#allocation2 + $0x40] sm:$0xff] %v422_v56  ;;  %685 = vst [vmem:[#allocation2 + $0x140] sm:$0xff] %v550_v57  ;;  %v840_v58 = vpop.f32.mrb[10].mxu0  ;;  %v872_v59 = vpop.f32.mrb[10].mxu1 }
  0xf0   :  { %656 = vst [vmem:[#allocation2 + $0x58] sm:$0xff] %v840_v58  ;;  %688 = vst [vmem:[#allocation2 + $0x158] sm:$0xff] %v872_v59  ;;  %v425_v60 = vpop.f32.mrb[11].mxu0  ;;  %v553_v61 = vpop.f32.mrb[11].mxu1 }
  0xf1   :  { %654 = vst [vmem:[#allocation2 + $0x48] sm:$0xff] %v425_v60  ;;  %686 = vst [vmem:[#allocation2 + $0x148] sm:$0xff] %v553_v61 }
  0xf5   :  { %v843_v62 = vpop.f32.mrb[12].mxu0  ;;  %v875_v63 = vpop.f32.mrb[12].mxu1 }
  0xf6   :  { %659 = vst [vmem:[#allocation2 + $0x70] sm:$0xff] %v843_v62  ;;  %691 = vst [vmem:[#allocation2 + $0x170] sm:$0xff] %v875_v63  ;;  %v438_v0 = vpop.f32.mrb[13].mxu0  ;;  %v566_v1 = vpop.f32.mrb[13].mxu1 }
  0xf7   :  { %657 = vst [vmem:[#allocation2 + $0x60] sm:$0xff] %v438_v0  ;;  %689 = vst [vmem:[#allocation2 + $0x160] sm:$0xff] %v566_v1  ;;  %v844_v2 = vpop.f32.mrb[14].mxu0  ;;  %v876_v3 = vpop.f32.mrb[14].mxu1 }
  0xf8   :  { %660 = vst [vmem:[#allocation2 + $0x78] sm:$0xff] %v844_v2  ;;  %692 = vst [vmem:[#allocation2 + $0x178] sm:$0xff] %v876_v3  ;;  %v441_v4 = vpop.f32.mrb[15].mxu0  ;;  %v569_v5 = vpop.f32.mrb[15].mxu1 }
  0xf9   :  { %658 = vst [vmem:[#allocation2 + $0x68] sm:$0xff] %v441_v4  ;;  %690 = vst [vmem:[#allocation2 + $0x168] sm:$0xff] %v569_v5 }
  0xfd   :  { %v847_v6 = vpop.f32.mrb[16].mxu0  ;;  %v879_v7 = vpop.f32.mrb[16].mxu1 }
  0xfe   :  { %663 = vst [vmem:[#allocation2 + $0x90] sm:$0xff] %v847_v6  ;;  %695 = vst [vmem:[#allocation2 + $0x190] sm:$0xff] %v879_v7  ;;  %v454_v8 = vpop.f32.mrb[17].mxu0  ;;  %v582_v9 = vpop.f32.mrb[17].mxu1 }
  0xff   :  { %661 = vst [vmem:[#allocation2 + $0x80] sm:$0xff] %v454_v8  ;;  %693 = vst [vmem:[#allocation2 + $0x180] sm:$0xff] %v582_v9  ;;  %v848_v10 = vpop.f32.mrb[18].mxu0  ;;  %v880_v11 = vpop.f32.mrb[18].mxu1 }
 0x100   :  { %664 = vst [vmem:[#allocation2 + $0x98] sm:$0xff] %v848_v10  ;;  %696 = vst [vmem:[#allocation2 + $0x198] sm:$0xff] %v880_v11  ;;  %v457_v12 = vpop.f32.mrb[19].mxu0  ;;  %v585_v13 = vpop.f32.mrb[19].mxu1 }
 0x101   :  { %662 = vst [vmem:[#allocation2 + $0x88] sm:$0xff] %v457_v12  ;;  %694 = vst [vmem:[#allocation2 + $0x188] sm:$0xff] %v585_v13 }
 0x105   :  { %v851_v14 = vpop.f32.mrb[20].mxu0  ;;  %v883_v15 = vpop.f32.mrb[20].mxu1 }
 0x106   :  { %667 = vst [vmem:[#allocation2 + $0xb0] sm:$0xff] %v851_v14  ;;  %699 = vst [vmem:[#allocation2 + $0x1b0] sm:$0xff] %v883_v15  ;;  %v470_v16 = vpop.f32.mrb[21].mxu0  ;;  %v598_v17 = vpop.f32.mrb[21].mxu1 }
 0x107   :  { %665 = vst [vmem:[#allocation2 + $0xa0] sm:$0xff] %v470_v16  ;;  %697 = vst [vmem:[#allocation2 + $0x1a0] sm:$0xff] %v598_v17  ;;  %v852_v18 = vpop.f32.mrb[22].mxu0  ;;  %v884_v19 = vpop.f32.mrb[22].mxu1 }
 0x108   :  { %668 = vst [vmem:[#allocation2 + $0xb8] sm:$0xff] %v852_v18  ;;  %700 = vst [vmem:[#allocation2 + $0x1b8] sm:$0xff] %v884_v19  ;;  %v473_v20 = vpop.f32.mrb[23].mxu0  ;;  %v601_v21 = vpop.f32.mrb[23].mxu1 }
 0x109   :  { %666 = vst [vmem:[#allocation2 + $0xa8] sm:$0xff] %v473_v20  ;;  %698 = vst [vmem:[#allocation2 + $0x1a8] sm:$0xff] %v601_v21 }
 0x10d   :  { %v855_v22 = vpop.f32.mrb[24].mxu0  ;;  %v887_v23 = vpop.f32.mrb[24].mxu1 }
 0x10e   :  { %671 = vst [vmem:[#allocation2 + $0xd0] sm:$0xff] %v855_v22  ;;  %703 = vst [vmem:[#allocation2 + $0x1d0] sm:$0xff] %v887_v23  ;;  %v486_v24 = vpop.f32.mrb[25].mxu0  ;;  %v614_v25 = vpop.f32.mrb[25].mxu1 }
 0x10f   :  { %669 = vst [vmem:[#allocation2 + $0xc0] sm:$0xff] %v486_v24  ;;  %701 = vst [vmem:[#allocation2 + $0x1c0] sm:$0xff] %v614_v25  ;;  %v856_v26 = vpop.f32.mrb[26].mxu0  ;;  %v888_v27 = vpop.f32.mrb[26].mxu1 }
 0x110   :  { %672 = vst [vmem:[#allocation2 + $0xd8] sm:$0xff] %v856_v26  ;;  %704 = vst [vmem:[#allocation2 + $0x1d8] sm:$0xff] %v888_v27  ;;  %v489_v28 = vpop.f32.mrb[27].mxu0  ;;  %v617_v29 = vpop.f32.mrb[27].mxu1 }
 0x111   :  { %670 = vst [vmem:[#allocation2 + $0xc8] sm:$0xff] %v489_v28  ;;  %702 = vst [vmem:[#allocation2 + $0x1c8] sm:$0xff] %v617_v29 }
 0x115   :  { %v859_v30 = vpop.f32.mrb[28].mxu0  ;;  %v891_v31 = vpop.f32.mrb[28].mxu1 }
 0x116   :  { %675 = vst [vmem:[#allocation2 + $0xf0] sm:$0xff] %v859_v30  ;;  %707 = vst [vmem:[#allocation2 + $0x1f0] sm:$0xff] %v891_v31  ;;  %v502_v32 = vpop.f32.mrb[29].mxu0  ;;  %v630_v33 = vpop.f32.mrb[29].mxu1 }
 0x117   :  { %673 = vst [vmem:[#allocation2 + $0xe0] sm:$0xff] %v502_v32  ;;  %705 = vst [vmem:[#allocation2 + $0x1e0] sm:$0xff] %v630_v33  ;;  %v860_v34 = vpop.f32.mrb[30].mxu0  ;;  %v892_v35 = vpop.f32.mrb[30].mxu1 }
 0x118   :  { %676 = vst [vmem:[#allocation2 + $0xf8] sm:$0xff] %v860_v34  ;;  %708 = vst [vmem:[#allocation2 + $0x1f8] sm:$0xff] %v892_v35  ;;  %v505_v36 = vpop.f32.mrb[31].mxu0  ;;  %v633_v37 = vpop.f32.mrb[31].mxu1 }
 0x119   :  { %674 = vst [vmem:[#allocation2 + $0xe8] sm:$0xff] %v505_v36  ;;  %706 = vst [vmem:[#allocation2 + $0x1e8] sm:$0xff] %v633_v37 }
 0x11a   :  { %946 = shalt.err (!%p943_p4)
}
 0x11b   :  { %s947_s22 = scalar_lea.hbm %s1126_s2, 8192 }
 0x11c   :  { %p948_p5 = scmp.ne.s32.totalorder %s1126_s2, %s947_s22  ;;  %p951_p6 = scmp.lt.u32.totalorder %s947_s22, %s1126_s2 }
 0x11e   :  { %p953_p7 = pnand %p951_p6, %p948_p5 }
 0x120   :  { %956 = shalt.err (!%p953_p7)
}
 0x121   :  { %s961_s27 = smov 128   ;;  %s962_s28 = smov 8  }
 0x122   :  { %720 = dma.vmem_to_hbm [thread:$0]  %s715_s18, 8192, %s1126_s2, [#allocation3], %s961_s27, %s961_s27, %s962_s28  }
 0x123   :  { %957 = dma.done.wait [#allocation3], 8192  }
 0x124   :  { %958 = vsyncadd [#allocation3], 4294959104 }
 0x125   :  { %724 = vsyncpa [#allocation3], 1 }

</bundles_post_ra>
